<compile_context>
chip_gen: v6e
topology: v6e:2x2x1
jax: 0.10.0
libtpu: 0.0.40
codegen_flags: <defaults>
</compile_context>

<pallas_src>
import jax
import jax.numpy as jnp
from jax.experimental import pallas as pl
from jax.experimental.pallas import tpu as pltpu


def _physical_vmem_bytes():
    """Best-effort physical VMEM query; conservative (v7x-sized) fallback."""
    try:
        return int(pltpu.get_tpu_info().vmem_capacity_bytes)
    except Exception:
        return 64 * 1024 * 1024


# ----------------------------------------------------------------------------
# Pallas kernel: fused pad_EV (EV_info=1) + conv_rgb + conv_mul + residual mix
# ----------------------------------------------------------------------------
def cevr_head_kernel(off_ref, w_ref, feat_ref, img_ref, out_ref):
    """One grid step == (batch element n, HW tile t).

    off_ref  : (N, 2)      SMEM, per-sample [step*wev_rgb + b_rgb, step*wev_mul + b_mul]
    w_ref    : (2, Cf)     packed 1x1-conv weights (feat dtype), row0=conv_rgb row1=conv_mul
    feat_ref : (1, Cf, T)  decoder feature tile (Cf = 64), VMEM, lane-dense on HW
    img_ref  : (1, Ci, T)  original input image tile (Ci = 3), VMEM, f32
    out_ref  : (1, Ci, T)  f32
    """
    n = pl.program_id(0)

    f = feat_ref[0]                                   # (Cf, T)
    w = w_ref[...]                                    # (2, Cf)

    # 1x1 convolution over channels == (2, Cf) x (Cf, T) matmul; HW on lanes.
    # This op is HBM-bandwidth-bound (~0.9 FLOP/byte); MXU precision is not the
    # bottleneck.  For exact f32-conv parity pass precision=HIGHEST here.
    proj = jnp.dot(w, f, preferred_element_type=jnp.float32)      # (2, T) f32

    # Fold constant EV channel + bias (precomputed per-sample offsets, SMEM).
    rgb = proj[0:1, :] + off_ref[n, 0]                # (1, T)  == conv_rgb(feature65)
    mul = proj[1:2, :] + off_ref[n, 1]                # (1, T)  == conv_mul(feature65)

    # feature + in_img * scaler  (broadcast (1,T) against (Ci,T))
    out_ref[0] = (rgb + img_ref[0] * mul).astype(out_ref.dtype)


def cevr_head(feat_nchw, img_nchw, step, W_rgb, b_rgb, W_mul, b_mul, tile_hw=None):
    """feat_nchw: (N, 64, H, W) f32 or bf16   img_nchw: (N, 3, H, W)   step: (N,)
    W_rgb/W_mul: (1, 65) f32 (1x1 conv weights, last entry = EV-channel weight)
    Returns (N, 3, H, W) f32, matching the PyTorch module's output."""
    N, Cf, H, W = feat_nchw.shape
    _, Ci, _, _ = img_nchw.shape
    HW = H * W

    feat_dtype = feat_nchw.dtype
    feat_bytes = jnp.dtype(feat_dtype).itemsize

    # NCHW flatten only — no transposes; HW lands on the lane axis.  Pad HW up
    # to a 128 multiple so every tile's stores stay unmasked (lane-dense).
    HW_pad = ((HW + 127) // 128) * 128
    feat = feat_nchw.reshape(N, Cf, HW)
    img = img_nchw.reshape(N, Ci, HW).astype(jnp.float32)
    if HW_pad != HW:
        pad = HW_pad - HW
        feat = jnp.pad(feat, ((0, 0), (0, 0), (0, pad)))
        img = jnp.pad(img, ((0, 0), (0, 0), (0, pad)))

    # Pack the two 1x1 convs into one (2, Cf) weight in the feature dtype (so a
    # bf16 feature map feeds the MXU natively); fold the EV-channel weight and
    # the biases into a per-sample scalar offset (N, 2) kept in SMEM (f32).
    w_pack = jnp.stack([W_rgb[0, :Cf], W_mul[0, :Cf]], axis=0).astype(feat_dtype)   # (2, Cf)
    wev = jnp.array([W_rgb[0, Cf], W_mul[0, Cf]], dtype=jnp.float32)                # (2,)
    bias = jnp.array([b_rgb[0], b_mul[0]], dtype=jnp.float32)                       # (2,)
    off = step.astype(jnp.float32)[:, None] * wev[None, :] + bias[None, :]          # (N, 2)

    # ---- Generation-aware tile selection -----------------------------------
    # Double-buffered footprint per pixel counts img/out tiles sublane-padded
    # (3 -> 8 rows): 2 * (Cf*feat_bytes + 8*4 + 8*4) bytes.
    phys_vmem = _physical_vmem_bytes()
    if phys_vmem >= 100 * 1024 * 1024:          # v5e / v6e: 128 MiB physical VMEM
        vmem_limit = 96 * 1024 * 1024
        t_cap = 131072
    else:                                        # v7x: 64 MiB physical VMEM
        vmem_limit = 56 * 1024 * 1024
        t_cap = 65536
    bytes_per_px = 2 * (Cf * feat_bytes + 8 * 4 + 8 * 4)
    t_budget = ((vmem_limit - 4 * 1024 * 1024) // bytes_per_px) // 128 * 128
    t_cap = max(128, min(t_cap, t_budget))
    if tile_hw is not None:
        t_cap = max(128, min(t_cap, (tile_hw // 128) * 128))

    T = HW_pad if HW_pad <= t_cap else t_cap
    n_hw = pl.cdiv(HW_pad, T)

    # Megacore coverage guard: guarantee >= 2 grid steps so both v7x
    # TensorCores get tiles (cost on 1-TC gens: one extra ~0.35 us step).
    if N * n_hw < 2 and HW_pad >= 256:
        T = (((HW_pad + 1) // 2) + 127) // 128 * 128
        n_hw = pl.cdiv(HW_pad, T)

    flops = N * HW_pad * (4 * Cf + 2 * Ci + 2)
    bytes_accessed = (N * HW_pad * (Cf * feat_bytes + Ci * 4 + Ci * 4)
                      + off.size * 4 + w_pack.size * feat_bytes)

    out = pl.pallas_call(
        cevr_head_kernel,
        out_shape=jax.ShapeDtypeStruct((N, Ci, HW_pad), jnp.float32),
        grid_spec=pltpu.PrefetchScalarGridSpec(
            num_scalar_prefetch=0,
            grid=(N, n_hw),
            in_specs=[
                pl.BlockSpec(memory_space=pltpu.MemorySpace.SMEM),   # off    (N, 2)
                pl.BlockSpec((2, Cf), lambda n, t: (0, 0)),          # w_pack (resident)
                pl.BlockSpec((1, Cf, T), lambda n, t: (n, 0, t)),    # feat tile
                pl.BlockSpec((1, Ci, T), lambda n, t: (n, 0, t)),    # img tile
            ],
            out_specs=pl.BlockSpec((1, Ci, T), lambda n, t: (n, 0, t)),
        ),
        compiler_params=pltpu.CompilerParams(
            dimension_semantics=("parallel", "parallel"),
            vmem_limit_bytes=vmem_limit,
        ),
        cost_estimate=pl.CostEstimate(
            flops=int(flops),
            transcendentals=0,
            bytes_accessed=int(bytes_accessed),
        ),
    )(off, w_pack, feat, img)

    if HW_pad != HW:
        out = out[:, :, :HW]
    # (N, 3, H*W) -> NCHW (pure reshape, no data movement).
    return out.reshape(N, Ci, H, W)


# ----------------------------------------------------------------------------
# Pure-JAX reference of the same head (pad_EV + 1x1 convs + residual), used to
# verify the kernel numerically.
# ----------------------------------------------------------------------------
def ref_head(feat_nchw, img_nchw, step, W_rgb, b_rgb, W_mul, b_mul):
    N, Cf, H, W = feat_nchw.shape
    ev = jnp.broadcast_to(step[:, None, None, None].astype(jnp.float32), (N, 1, H, W))
    feat65 = jnp.concatenate([feat_nchw.astype(jnp.float32), ev], axis=1)  # pad_EV, EV_info=1
    rgb = jnp.einsum('nchw,oc->nohw', feat65, W_rgb) + b_rgb[None, :, None, None]
    mul = jnp.einsum('nchw,oc->nohw', feat65, W_mul) + b_mul[None, :, None, None]
    return rgb + img_nchw * mul


if __name__ == "__main__":
    key = jax.random.PRNGKey(0)
    k_feat, k_img, k_wr, k_wm = jax.random.split(key, 4)

    N, H, W = 2, 16, 16
    Cf = 64      # decoder output channels (65 = 64 + 1 EV channel feeds the 1x1 convs)
    Ci = 3       # RGB input image channels

    # Original input image (the module's `x` / `in_img`), NCHW.
    x = jax.random.normal(k_img, (N, Ci, H, W), dtype=jnp.float32)
    # Per-sample EV step / origin (origin unused when EV_info == 1).
    step = jnp.array([0.5, -1.0], dtype=jnp.float32)
    origin = jnp.zeros((N,), dtype=jnp.float32)  # noqa: F841  (EV_info=1: unused)

    # Stand-in for the decoder output feature map (backbone not available).
    feat = jax.random.normal(k_feat, (N, Cf, H, W), dtype=jnp.float32)

    # Deterministic "kaiming-uniform"-style init for the two 1x1 convs (65 -> 1).
    fan_in = Cf + 1
    bound = (6.0 / fan_in) ** 0.5
    W_rgb = jax.random.uniform(k_wr, (1, fan_in), minval=-bound, maxval=bound, dtype=jnp.float32)
    W_mul = jax.random.uniform(k_wm, (1, fan_in), minval=-bound, maxval=bound, dtype=jnp.float32)
    b_rgb = jnp.zeros((1,), dtype=jnp.float32)
    b_mul = jnp.zeros((1,), dtype=jnp.float32)

    # --- f32 feature path ----------------------------------------------------
    out = jax.block_until_ready(cevr_head(feat, x, step, W_rgb, b_rgb, W_mul, b_mul))
    ref = ref_head(feat, x, step, W_rgb, b_rgb, W_mul, b_mul)
    assert out.shape == (N, Ci, H, W)
    assert jnp.allclose(out, ref, atol=1e-4, rtol=1e-4), "Pallas head (f32) mismatch vs reference"

    # --- bf16 feature fast path (halves the dominant HBM stream) -------------
    feat_bf16 = feat.astype(jnp.bfloat16)
    out_b = jax.block_until_ready(cevr_head(feat_bf16, x, step, W_rgb, b_rgb, W_mul, b_mul))

    def _quantize_w(Wm):  # mirror the kernel's bf16 cast of the 64 real channels
        return jnp.concatenate(
            [Wm[:, :Cf].astype(jnp.bfloat16).astype(jnp.float32), Wm[:, Cf:]], axis=1)

    ref_b = ref_head(feat_bf16.astype(jnp.float32), x, step,
                     _quantize_w(W_rgb), b_rgb, _quantize_w(W_mul), b_mul)
    assert jnp.allclose(out_b, ref_b, atol=1e-3, rtol=1e-3), "Pallas head (bf16) mismatch vs reference"

    # --- odd resolution: exercises lane padding + megacore coverage guard ----
    H2 = W2 = 15
    x2 = jax.random.normal(k_img, (1, Ci, H2, W2), dtype=jnp.float32)
    f2 = jax.random.normal(k_feat, (1, Cf, H2, W2), dtype=jnp.float32)
    s2 = jnp.array([1.5], dtype=jnp.float32)
    out2 = jax.block_until_ready(cevr_head(f2, x2, s2, W_rgb, b_rgb, W_mul, b_mul))
    ref2 = ref_head(f2, x2, s2, W_rgb, b_rgb, W_mul, b_mul)
    assert out2.shape == (1, Ci, H2, W2)
    assert jnp.allclose(out2, ref2, atol=1e-4, rtol=1e-4), "Pallas head (odd HW) mismatch vs reference"

    print("KERNEL_OK")
</pallas_src>

<mosaic_0001>
module attributes {stable_mosaic.version = 11 : i64} {
  func.func @cevr_head_kernel(%arg0: i32, %arg1: i32, %arg2: memref<2x2xf32, #tpu.memory_space<smem>>, %arg3: memref<2x64xf32, #tpu.memory_space<vmem>>, %arg4: memref<1x64x256xf32, #tpu.memory_space<vmem>>, %arg5: memref<1x3x256xf32, #tpu.memory_space<vmem>>, %arg6: memref<1x3x256xf32, #tpu.memory_space<vmem>>) attributes {dimension_semantics = [#tpu.dimension_semantics<parallel>, #tpu.dimension_semantics<parallel>], iteration_bounds = array<i64: 2, 1>, scalar_prefetch = 0 : i64, scratch_operands = 0 : i64, tpu.core_type = #tpu.core_type<tc>, window_params = [{transform_indices = @transform_0, window_bounds = array<i64: 2, 2>}, {pipeline_mode = #tpu.pipeline_mode<synchronous>, transform_indices = @transform_1, window_bounds = array<i64: 2, 64>}, {transform_indices = @transform_2, window_bounds = array<i64: 1, 64, 256>}, {transform_indices = @transform_3, window_bounds = array<i64: 1, 3, 256>}, {transform_indices = @transform_4, window_bounds = array<i64: 1, 3, 256>}]} {
    %c0 = arith.constant 0 : index
    %c0_0 = arith.constant 0 : index
    %c0_1 = arith.constant 0 : index
    %0 = vector.load %arg4[%c0, %c0_0, %c0_1] : memref<1x64x256xf32, #tpu.memory_space<vmem>>, vector<1x64x256xf32>
    %1 = vector.shape_cast %0 : vector<1x64x256xf32> to vector<64x256xf32>
    %c0_2 = arith.constant 0 : index
    %c0_3 = arith.constant 0 : index
    %2 = vector.load %arg3[%c0_2, %c0_3] : memref<2x64xf32, #tpu.memory_space<vmem>>, vector<2x64xf32>
    %cst = arith.constant dense<0.000000e+00> : vector<2x256xf32>
    %3 = tpu.matmul %2, %1, %cst {dimension_numbers = #tpu.dot_dimension_numbers<[1], [0], [0], [1], [0, 0, 1, 1], [], []>} : vector<2x64xf32>, vector<64x256xf32>, vector<2x256xf32> -> vector<2x256xf32>
    %4 = vector.extract_strided_slice %3 {offsets = [0, 0], sizes = [1, 256], strides = [1, 1]} : vector<2x256xf32> to vector<1x256xf32>
    %5 = arith.index_cast %arg0 : i32 to index
    %c0_4 = arith.constant 0 : index
    %6 = memref.load %arg2[%5, %c0_4] : memref<2x2xf32, #tpu.memory_space<smem>>
    %7 = vector.broadcast %6 : f32 to vector<1x256xf32>
    %8 = arith.addf %4, %7 : vector<1x256xf32>
    %9 = vector.extract_strided_slice %3 {offsets = [1, 0], sizes = [1, 256], strides = [1, 1]} : vector<2x256xf32> to vector<1x256xf32>
    %10 = arith.index_cast %arg0 : i32 to index
    %c1 = arith.constant 1 : index
    %11 = memref.load %arg2[%10, %c1] : memref<2x2xf32, #tpu.memory_space<smem>>
    %12 = vector.broadcast %11 : f32 to vector<1x256xf32>
    %13 = arith.addf %9, %12 : vector<1x256xf32>
    %c0_5 = arith.constant 0 : index
    %c0_6 = arith.constant 0 : index
    %c0_7 = arith.constant 0 : index
    %14 = vector.load %arg5[%c0_5, %c0_6, %c0_7] : memref<1x3x256xf32, #tpu.memory_space<vmem>>, vector<1x3x256xf32>
    %15 = vector.shape_cast %14 : vector<1x3x256xf32> to vector<3x256xf32>
    %16 = vector.broadcast %13 : vector<1x256xf32> to vector<3x256xf32>
    %17 = arith.mulf %15, %16 : vector<3x256xf32>
    %18 = vector.broadcast %8 : vector<1x256xf32> to vector<3x256xf32>
    %19 = arith.addf %18, %17 : vector<3x256xf32>
    %c0_8 = arith.constant 0 : index
    %c0_9 = arith.constant 0 : index
    %c0_10 = arith.constant 0 : index
    %20 = vector.load %arg6[%c0_8, %c0_9, %c0_10] : memref<1x3x256xf32, #tpu.memory_space<vmem>>, vector<1x3x256xf32>
    %21 = vector.shape_cast %20 : vector<1x3x256xf32> to vector<3x256xf32>
    %22 = vector.shape_cast %19 : vector<3x256xf32> to vector<1x3x256xf32>
    tpu.vector_store %arg6[%c0_8, %c0_9, %c0_10], %22 {strides = array<i32>} : memref<1x3x256xf32, #tpu.memory_space<vmem>>, vector<1x3x256xf32>,
    return
  }
  func.func @transform_0(%arg0: i32, %arg1: i32) -> (i32, i32) {
    %c0_i32 = arith.constant 0 : i32
    %c0_i32_0 = arith.constant 0 : i32
    %c0_i32_1 = arith.constant 0 : i32
    return %c0_i32, %c0_i32_0 : i32, i32
  }
  func.func @transform_1(%arg0: i32, %arg1: i32) -> (i32, i32) {
    %c0_i32 = arith.constant 0 : i32
    %c0_i32_0 = arith.constant 0 : i32
    %c0_i32_1 = arith.constant 0 : i32
    return %c0_i32, %c0_i32_0 : i32, i32
  }
  func.func @transform_2(%arg0: i32, %arg1: i32) -> (i32, i32, i32) {
    %c0_i32 = arith.constant 0 : i32
    %c0_i32_0 = arith.constant 0 : i32
    return %arg0, %c0_i32, %arg1 : i32, i32, i32
  }
  func.func @transform_3(%arg0: i32, %arg1: i32) -> (i32, i32, i32) {
    %c0_i32 = arith.constant 0 : i32
    %c0_i32_0 = arith.constant 0 : i32
    return %arg0, %c0_i32, %arg1 : i32, i32, i32
  }
  func.func @transform_4(%arg0: i32, %arg1: i32) -> (i32, i32, i32) {
    %c0_i32 = arith.constant 0 : i32
    %c0_i32_0 = arith.constant 0 : i32
    return %arg0, %c0_i32, %arg1 : i32, i32, i32
  }
}

</mosaic_0001>

<bundles_post_ra>
// kernel: tpu_custom_call.1
= control target key start
LH: loop header
LB: loop body
LE: loop exit
PB: predicated region body
PF: predicated region fallthrough
CT: control target
= control target key end

     0   :  { %9 = vsyncpa [#allocation4], 0  ;;  %s921_s0 = inlined_call_operand.vmem [shape: f32[2,2], index: 0, kind: input, shape index: {}]   ;;  %s922_s1 = inlined_call_operand.vmem [shape: f32[2,64], index: 1, kind: input, shape index: {}]   ;;  %s923_s2 = inlined_call_operand.hbm [shape: f32[2,64,256], index: 2, kind: input, shape index: {}]   ;;  %s924_s3 = inlined_call_operand.vmem [shape: f32[2,3,256], index: 3, kind: input, shape index: {}]   ;;  %s925_s4 = inlined_call_operand.vmem [shape: f32[2,3,256], index: 4, kind: output, shape index: {}]  }
   0x1   :  { %10 = vsyncpa [#allocation3], 0 }
   0x2   :  { %12 = vsyncpa [#allocation3 + $0x1], 0  ;;  %s775_s15 = smov 0   ;;  %s777_s16 = smov 0  }
   0x3   :  { %s779_s17 = smov 0   ;;  %s781_s18 = smov 0  }
   0x4   :  { %s783_s19 = smov 0   ;;  %s785_s20 = smov 0  }
   0x5 LB: > { %s555_s21 = sadd.s32 4294967295, %s743_s20   ;;  %s81_s22 = sadd.s32 1, %s731_s17  ;;  %s743_s20 = sphi %s785_s20, %s18_s20   ;;  %s739_s19 = sphi %s783_s19, %s939_s19   ;;  %s735_s18 = sphi %s781_s18, %s938_s18   ;;  %s731_s17 = sphi %s779_s17, %s937_s17   ;;  %s727_s16 = sphi %s777_s16, %s936_s16   ;;  %s723_s15 = sphi %s775_s15, %s935_s15  }
   0x6   : > { %p88_p0 = scmp.ne.s32.totalorder %s731_s17, %s727_s16  ;;  %p89_p1 = scmp.eq.s32.totalorder %s743_s20, 0 }
   0x7   : > { %p94_p2 = scmp.ne.s32.totalorder %s727_s16, %s723_s15  ;;  %p809_p3 = scmp.eq.s32.totalorder %s555_s21, 0 }
   0x8   : > { %p90_p4 = por %p89_p1, %p88_p0  ;;  %p557_p5 = scmp.ge.s32.totalorder %s743_s20, 1 }
   0x9   : > { %p816_p6 = por %p809_p3, %p94_p2  ;;  %p161_p7 = scmp.lt.s32.totalorder %s743_s20, 3 }
   0xa   : > { %s174_s27 = sshll.u32 %s921_s0, 4  ;;  %p592_p10 = scmp.lt.s32.totalorder %s743_s20, 2  ;;  %s175_s27 = int_to_ptr.vmem [resolvable:$true] %s174_s27 }
   0xb   : > { %s929_s24 = scalar_select %p816_p6, 1, 0 }
   0xc   : > { %p824_p8 = pnand %p557_p5, %p161_p7  ;;  %s188_s29 = sand.u32 1, %s731_s17  }
   0xd   : > { %p834_p12 = pnand %p592_p10, %p90_p4  ;;  %s646_s5 = scalar_lea.vmem %s175_s27, 32 }
   0xe   : > { %s930_s28 = scalar_select %p824_p8, 1, 0 }
   0xf   : > { %p583_p9 = pneg %p824_p8  ;;  %p647_p13 = scmp.ne.s32.totalorder %s175_s27, %s646_s5 }
  0x10   : > { %p654_p5 = scmp.lt.s32.totalorder %s175_s27, %s175_s27  ;;  %p655_p7 = scmp.lt.s32.totalorder %s646_s5, %s646_s5 }
  0x11   : > { %p584_p11 = pnand %p583_p9, %p809_p3 }
  0x12   : > { %p656_p6 = por %p655_p7, %p654_p5 }
  0x13   : > { %p648_p0 = pneg %p584_p11 }
  0x15   : > { %p649_p1 = pnand %p648_p0, %p647_p13 }
  0x17   : > { %p650_p2 = pneg %p649_p1 }
  0x19   : > { %p657_p8 = pnand %p656_p6, %p650_p2 }
  0x1b   : > { %660 = shalt.err (!%p657_p8)
}
  0x1c   : > { %s745_s6 = smov [#allocation2]   ;;  %s30_s7 = sadd.s32 1, %s739_s19 }
  0x1d   : > { %586 = dma.vmem_to_smem (!%p584_p11), %s175_s27, 32, %s745_s6, [#allocation4]  }
  0x1e   : > { %s560_s8 = sshll.u32 %s188_s29, 7  ;;  %p32_p4 = scmp.ge.s32.totalorder %s30_s7, 2 }
  0x1f   : > { %s574_s9 = sshll.u32 %s739_s19, 11  ;;  %s192_s10 = scalar_lea.vmem [#allocation5], %s560_s8 }
  0x20   : > { %s201_s11 = sshll.u32 %s192_s10, 4  ;;  %s941_s7 = smov (%p32_p4, %s30_s7), 0  ;;  %s202_s11 = int_to_ptr.vmem [resolvable:$true] %s201_s11 }
  0x21   : > { %s200_s14 = scalar_lea.hbm %s923_s2, %s574_s9  ;;  %s76_s15 = ssub.s32 %s739_s19, %s941_s7 }
  0x22   : > { %p847_p6 = scmp.eq.s32.totalorder %s76_s15, 0  ;;  %s189_s25 = scalar_lea.sflag [#allocation3], %s188_s29 }
  0x23   : > { %p663_p8 = pneg %p834_p12  ;;  %s674_s26 = scalar_lea.vmem %s202_s11, 2048 }
  0x24   : > { %p675_p9 = scmp.ne.s32.totalorder %s202_s11, %s674_s26  ;;  %s746_s27 = smov [#allocation5]  }
  0x25   : > { %s679_s5 = sshll.u32 %s746_s27, 4  ;;  %s680_s5 = int_to_ptr.vmem [resolvable:$false] %s679_s5 }
  0x26   : > { %p677_p10 = pnand %p675_p9, %p663_p8  ;;  %s681_s6 = scalar_lea.vmem %s680_s5, 4096 }
  0x27   : > { %p682_p13 = scmp.lt.s32.totalorder %s202_s11, %s680_s5  ;;  %p683_p0 = scmp.lt.s32.totalorder %s681_s6, %s674_s26 }
  0x28   : > { %p678_p11 = pneg %p677_p10 }
  0x29   : > { %p684_p1 = por %p683_p0, %p682_p13 }
  0x2b   : > { %p685_p2 = pnand %p684_p1, %p678_p11 }
  0x2d   : > { %688 = shalt.err (!%p685_p2)
}
  0x2e   : > { %s747_s8 = smov 256   ;;  %s748_s29 = smov 16  }
  0x2f   : > { %590 = dma.hbm_to_vmem [thread:$0]  (!%p834_p12), %s200_s14, 2048, %s202_s11, %s189_s25, %s747_s8, %s747_s8, %s748_s29  }
  0x30   : > { %s860_s9 = scalar_select %p847_p6, %s731_s17, %s81_s22  }
  0x31   : > { %p933_p5 = scmp.ne.s32.totalorder %s930_s28, 0 }
  0x33   : > { %226 = sbr.rel (%p933_p5) target bundleno = 290 (0x122), region = 36 }
  0x38   : > { %714 = dma.done.wait (%p809_p3), [#allocation4], 32  }
  0x39   : > { %716 = vsyncadd (%p809_p3), [#allocation4], 4294967264  ;;  %s232_s10 = sand.u32 1, %s727_s16   ;;  %p934_p12 = scmp.ne.s32.totalorder %s929_s24, 0 }
  0x3a   : > { %s565_s12 = sshll.u32 %s232_s10, 7  ;;  %s233_s13 = scalar_lea.sflag [#allocation3], %s232_s10 }
  0x3b   : > { %s869_s30 = scalar_lea.vmem [#allocation5], %s565_s12 }
  0x3c   : > { %718 = dma.done.wait (%p934_p12), %s233_s13, 2048  }
  0x3d   : > { %720 = vsyncadd (%p934_p12), %s233_s13, 4294965248 }
  0x3e   : > { %241 = sfence }
  0x3f   : > { %v311_v0 = vld [vmem:[%s869_s30 + $0x78] sm:$0xff]  ;;  %v310_v1 = vld [vmem:[%s869_s30 + $0x70] sm:$0xff]  ;;  %v309_v2 = vld [vmem:[%s869_s30 + $0x68] sm:$0xff]  ;;  %v749_v4 = vmov 0.0   ;;  %vm313_vm0 = vcmask 523264   ;;  %s571_s24 = sshll.u32 %s735_s18, 7  ;;  %v399_v18 = vlaneseq }
  0x40   : > { %333 = vmatprep.subr.mxu0 %v311_v0  ;;  %v308_v3 = vld [vmem:[%s869_s30 + $0x60] sm:$0xff]  ;;  %381 = vmatprep.mubr.f32.mxu0 %v749_v4  ;;  %v307_v5 = vld [vmem:[%s869_s30 + $0x58] sm:$0xff]  ;;  %v306_v6 = vld [vmem:[%s869_s30 + $0x50] sm:$0xff]  ;;  %s393_s28 = sadd.s32 1, %s571_s24  ;;  %p277_p3 = scmp.lt.s32.totalorder %s735_s18, 1 }
  0x41   : > { %334 = vmatpush1.msra.mxu0 %v310_v1  ;;  %v305_v7 = vld [vmem:[%s869_s30 + $0x48] sm:$0xff]  ;;  %v304_v8 = vld [vmem:[%s869_s30 + $0x40] sm:$0xff]  ;;  %v303_v9 = vld [vmem:[%s869_s30 + $0x38] sm:$0xff]  ;;  %s394_s11 = sld [smem:[#allocation2 + %s393_s28]]  ;;  %v400_v19 = vshrl.u32 %v399_v18, 7 }
  0x42   : > { %335 = vmatprep.subr.mxu0 %v309_v2  ;;  %v302_v10 = vld [vmem:[%s869_s30 + $0x30] sm:$0xff]  ;;  %v301_v11 = vld [vmem:[%s869_s30 + $0x28] sm:$0xff]  ;;  %v300_v12 = vld [vmem:[%s869_s30 + $0x20] sm:$0xff]  ;;  %s389_s14 = sld [smem:[#allocation2 + %s571_s24]]  ;;  %s943_s18 = smov (!%p277_p3, %s735_s18), 1 }
  0x43   : > { %336 = vmatpush1.msra.mxu0 %v308_v3  ;;  %v299_v13 = vld [vmem:[%s869_s30 + $0x18] sm:$0xff]  ;;  %v298_v14 = vld [vmem:[%s869_s30 + $0x10] sm:$0xff]  ;;  %v297_v15 = vld [vmem:[%s869_s30 + $0x8] sm:$0xff]  ;;  %s575_s15 = sshll.u32 %s943_s18, 3  ;;  %v401_v23 = vsub.s32 1, %v400_v19  ;;  %v414_v33 = vsub.s32 0, %v400_v19 }
  0x44   : > { %337 = vmatprep.subr.mxu0 %v307_v5  ;;  %v296_v16 = vld [vmem:[%s869_s30] sm:$0xff]  ;;  %s284_s26 = scalar_lea.vmem %s924_s3, %s575_s15  ;;  %s294_s5 = scalar_lea.vmem %s925_s4, %s575_s15 }
  0x45   : > { %338 = vmatpush1.msra.mxu0 %v306_v6  ;;  %v312_v17 = vld [vmem:[%s922_s1] sm:$0x3] }
  0x46   : > { %339 = vmatprep.subr.mxu0 %v305_v7  ;;  %v398_v29 = vld [vmem:[%s284_s26] sm:$0x77] }
  0x47   : > { %340 = vmatpush1.msra.mxu0 %v304_v8  ;;  %v395_v20 = vstv %s394_s11 }
  0x48   : > { %341 = vmatprep.subr.mxu0 %v303_v9  ;;  %v390_v26 = vstv %s389_s14 }
  0x49   : > { %342 = vmatpush1.msra.mxu0 %v302_v10 }
  0x4a   : > { %343 = vmatprep.subr.mxu0 %v301_v11 }
  0x4b   : > { %344 = vmatpush1.msra.mxu0 %v300_v12 }
  0x4c   : > { %345 = vmatprep.subr.mxu0 %v299_v13 }
  0x4d   : > { %346 = vmatpush1.msra.mxu0 %v298_v14 }
  0x4e   : > { %347 = vmatprep.subr.mxu0 %v297_v15 }
  0x4f   : > { %348 = vmatpush1.msra.mxu0 %v296_v16 }
  0x50   : > { %570 = vmatmul.mubr.msk.f32.vlgmr.msra.gmra.mxu0 %vm313_vm0, %v312_v17 }
 0x110   : > { %v383_v21 = vpop.f32.mrf.mxu0 }
 0x111   : > { %v396_v22 = vadd.f32 %v395_v20, %v383_v21  ;;  %v391_v30 = vadd.f32 %v390_v26, %v383_v21 }
 0x112   : > { %v385_v24 = vpop.f32.mrf.mxu0 }
 0x113   : > { %v397_v25 = vadd.f32 %v395_v20, %v385_v24  ;;  %v402_v27 = vrot.slane %v396_v22, %v401_v23  ;;  %v392_v31 = vadd.f32 %v390_v26, %v385_v24  ;;  %v415_v35 = vrot.slane %v391_v30, %v414_v33 }
 0x115   : > { %v406_v28 = vrot.slane %v397_v25, %v401_v23  ;;  %v419_v36 = vrot.slane %v392_v31, %v414_v33 }
 0x117   : > { %v409_v32 = vcombine.low %v402_v27, %v406_v28 }
 0x119   : > { %v411_v34 = vmul.f32 %v409_v32, %v398_v29 }
 0x11b   : > { %v421_v37 = vcombine.high %v411_v34, %v411_v34  ;;  %v423_v38 = vadd.f32 %v415_v35, %v411_v34 }
 0x11d   : > { %v424_v39 = vadd.f32 %v421_v37, %v419_v36 }
 0x11f   : > { %v427_v40 = vcombine.low %v423_v38, %v424_v39 }
 0x121   : > { %429 = vst [vmem:[%s294_s5] sm:$0x77] %v427_v40 }
 0x122 PF: > { %s18_s20 = sadd.s32 1, %s743_s20   ;;  %s935_s15 = smov %s727_s16 }
 0x123   : > { %p15_p7 = scmp.ge.s32.totalorder %s18_s20, 4   ;;  %s936_s16 = smov %s731_s17 }
 0x124   : > { %s937_s17 = smov %s860_s9  ;;  %s938_s18 = smov %s739_s19 }
 0x125   : > { %s939_s19 = smov %s941_s7  ;;  %17 = sbr.rel (!%p15_p7) target bundleno = 5 (0x5), region = 84 }
 0x12a   :  { %460 = vsyncpa [#allocation3], 1 }
 0x12b   :  { %462 = vsyncpa [#allocation3 + $0x1], 1 }
 0x12c   :  { %463 = vsyncpa [#allocation4], 1 }
 0x12d   :  { %465 = vsyncpa [#allocation4 + $0x1], 1 }

</bundles_post_ra>
